<compile_context>
chip_gen: v6e
topology: v6e:2x2x1
jax: 0.10.0
libtpu: 0.0.40
codegen_flags: <defaults>
</compile_context>

<pallas_src>
import functools

import jax
import jax.numpy as jnp
from jax import lax
from jax.experimental import pallas as pl
from jax.experimental.pallas import tpu as pltpu

_C = 128            # lane width (vreg lane dimension)
_TARGET_ROWS = 2048  # rows per block: <= 1 MiB f32 per input per grid step


def _quantities(a, b, similarity):
    """Per-element quantities whose global sums the loss needs (select-based)."""
    both = jnp.logical_and(a >= 1.0, b >= 1.0)
    one = jnp.where(both, 1.0, 0.0)               # -> num = sum(mask)
    if similarity == "SSD":
        # mask is binary, so (mask*i - mask*j)^2 == where(mask, i-j, 0)^2.
        d = jnp.where(both, a - b, 0.0)
        return (one, d * d)                        # direct (I-J)^2: no cancellation
    I = jnp.where(both, a, 0.0)
    J = jnp.where(both, b, 0.0)
    return (one, I, J, I * I, J * J, I * J)


def _sim_sums_kernel(a0_ref, b0_ref, a1_ref, b1_ref, out_ref, *,
                     bm, bpp, n_rows, similarity, needs_mask, unroll):
    c = pl.program_id(0)     # parallel row-range chunk (one per TC on v7x)
    s = pl.program_id(1)     # streaming block within the chunk (reduction axis)

    @pl.when(s == 0)
    def _():
        out_ref[...] = jnp.zeros_like(out_ref)

    nq = 2 if similarity == "SSD" else 6
    n_groups = bm // 8
    row0 = (c * bpp + s) * bm          # UNCLAMPED first global row of this block

    def body(k, accs):
        start = pl.multiple_of(k * 8, 8)
        a0 = a0_ref[pl.ds(start, 8), :].astype(jnp.float32)
        b0 = b0_ref[pl.ds(start, 8), :].astype(jnp.float32)
        a1 = a1_ref[pl.ds(start, 8), :].astype(jnp.float32)
        b1 = b1_ref[pl.ds(start, 8), :].astype(jnp.float32)
        if needs_mask:
            # Only compiled in when the blocks do not exactly tile the slab:
            # rows at/after n_rows (ragged last block, or a clamped redundant
            # step) are zeroed so the >=1 mask rejects them.
            r = lax.broadcasted_iota(jnp.int32, (8, _C), 0)
            valid = (row0 + k * 8 + r) < n_rows
            zero = jnp.zeros((8, _C), jnp.float32)
            a0 = jnp.where(valid, a0, zero)
            b0 = jnp.where(valid, b0, zero)
            a1 = jnp.where(valid, a1, zero)
            b1 = jnp.where(valid, b1, zero)
        q = _quantities(a0, b0, similarity) + _quantities(a1, b1, similarity)
        return tuple(acc + qi for acc, qi in zip(accs, q))

    init = tuple(jnp.zeros((8, _C), jnp.float32) for _ in range(2 * nq))
    accs = lax.fori_loop(0, n_groups, body, init, unroll=unroll)

    for idx, acc in enumerate(accs):
        out_ref[0, idx] += acc


def _fused_pair_sums(a0, b0, a1, b1, similarity):
    """Global sums for BOTH image pairs in one streaming pallas_call.

    Returns a (2*nq,) f32 vector: pair0 sums followed by pair1 sums, where
    nq = 2 (SSD: [num, ssd]) or 6 (NCC: [num, sI, sJ, sII, sJJ, sIJ]).
    """
    assert a0.shape == b0.shape == a1.shape == b1.shape
    n = a0.size
    # Minimal zero pad only when n is not lane-aligned (rare).  Zero pad is
    # exact: mask = (0>=1)&(0>=1) = 0, so padded pixels add 0 to every sum.
    # TODO(synk): handle the <128-element tail in-kernel to avoid this copy if
    # non-lane-aligned shapes ever become common.
    n_pad = max(pl.cdiv(n, _C) * _C, 8 * _C)

    def to_slab(x):
        xf = x.reshape(-1)
        if n_pad != n:
            xf = jnp.pad(xf, (0, n_pad - n))
        return xf.reshape(n_pad // _C, _C)

    slabs = [to_slab(x) for x in (a0, b0, a1, b1)]
    R = n_pad // _C

    n_par = 2 if R >= 16 else 1                        # occupy both v7x TCs
    rows_per_chunk = pl.cdiv(pl.cdiv(R, n_par), 8) * 8
    bm = min(rows_per_chunk, _TARGET_ROWS)             # multiple of 8, <=1 MiB f32
    bpp = pl.cdiv(rows_per_chunk, bm)                  # streaming steps per chunk
    nblk_real = pl.cdiv(R, bm)                         # last fetchable block + 1
    needs_mask = (n_par * bpp * bm) != R               # ragged / redundant steps
    nq = 2 if similarity == "SSD" else 6
    n_out = 2 * nq
    unroll = max(1, min(8, bm // 8))

    def in_map(c, s):
        # Clamp so the DMA never starts past the slab end; a clamped
        # (redundant) step contributes nothing because the in-kernel row mask
        # uses the UNCLAMPED block index.
        return (jnp.minimum(c * bpp + s, nblk_real - 1), 0)

    kernel = functools.partial(
        _sim_sums_kernel, bm=bm, bpp=bpp, n_rows=R, similarity=similarity,
        needs_mask=needs_mask, unroll=unroll)

    partials = pl.pallas_call(
        kernel,
        out_shape=jax.ShapeDtypeStruct((n_par, n_out, 8, _C), jnp.float32),
        grid_spec=pltpu.PrefetchScalarGridSpec(
            num_scalar_prefetch=0,
            grid=(n_par, bpp),
            in_specs=[pl.BlockSpec((bm, _C), in_map) for _ in range(4)],
            out_specs=pl.BlockSpec((1, n_out, 8, _C),
                                   lambda c, s: (c, 0, 0, 0))),
        compiler_params=pltpu.CompilerParams(
            dimension_semantics=("parallel", "arbitrary")),
    )(*slabs)

    # Tiny (<=96 KiB) cross-lane reduce; fuses into the scalar epilogue HLO.
    return jnp.sum(partials, axis=(0, 2, 3))


def _apply_descriptor(x, descriptor):
    # TODO(synk): denseCFOG / denseLSS are external dense-descriptor operators
    # not defined in the reference module; treated as identity here.  With a
    # real descriptor, the >=1 masks still come from the raw images and the
    # values from the descriptor outputs (separate kernel operands).
    del descriptor
    return x


def _pair_loss_from_sums(s, n_elems, similarity, eps=1e-5):
    num = s[0]
    if similarity == "SSD":
        return s[1] / num
    n = jnp.float32(n_elems)                 # torch .mean(): all H*W elements
    I_ave, J_ave = s[1] / n, s[2] / n
    I2_ave, J2_ave = s[3] / n, s[4] / n
    IJ_ave = s[5] / n
    cross = IJ_ave - I_ave * J_ave
    I_var = I2_ave - I_ave * I_ave
    J_var = J2_ave - J_ave * J_ave
    cc = cross / (jnp.sqrt(I_var) * jnp.sqrt(J_var) + eps)
    gncc = -1.0 * cc + 1.0
    return gncc * 512.0 * 512.0 / num        # 512*512 hard-coded, as in torch


@functools.partial(jax.jit, static_argnames=("descriptor", "similarity"))
def sim_loss_forward(reference, sensed_tran, sensed, reference_inv_tran,
                     *, descriptor, similarity):
    if similarity not in ("SSD", "NCC"):
        raise ValueError(f"unknown similarity: {similarity!r}")
    a0 = _apply_descriptor(reference, descriptor)
    b0 = _apply_descriptor(sensed_tran, descriptor)
    a1 = _apply_descriptor(sensed, descriptor)
    b1 = _apply_descriptor(reference_inv_tran, descriptor)

    sums = _fused_pair_sums(a0, b0, a1, b1, similarity)
    nq = 2 if similarity == "SSD" else 6
    loss1 = _pair_loss_from_sums(sums[:nq], reference.size, similarity)
    loss2 = _pair_loss_from_sums(sums[nq:], sensed.size, similarity)
    return (loss1 + loss2) * 0.5


class SimLoss:
    """JAX/Pallas port of the PyTorch SimLoss module (forward pass only)."""

    def __init__(self, gamma):
        self.gamma = gamma   # kept for parity with the torch module; unused in forward

    def __call__(self, reference, sensed_tran, sensed, reference_inv_tran,
                 descriptor, similarity):
        return sim_loss_forward(reference, sensed_tran, sensed,
                                reference_inv_tran,
                                descriptor=descriptor, similarity=similarity)


# ----------------------------- pure-JAX reference -----------------------------
def _ref_pair_loss(i_img, j_img, similarity, eps=1e-5):
    mask = ((jnp.squeeze(i_img) >= 1) & (jnp.squeeze(j_img) >= 1)).astype(jnp.float32)
    num = jnp.sum(mask)
    des_i = i_img * mask
    des_j = j_img * mask
    if similarity == "SSD":
        return jnp.sum((des_i - des_j) ** 2) / num
    I, J = des_i, des_j
    I_ave, J_ave = jnp.mean(I), jnp.mean(J)
    I2_ave, J2_ave = jnp.mean(I * I), jnp.mean(J * J)
    IJ_ave = jnp.mean(I * J)
    cross = IJ_ave - I_ave * J_ave
    I_var = I2_ave - I_ave ** 2
    J_var = J2_ave - J_ave ** 2
    cc = cross / (jnp.sqrt(I_var) * jnp.sqrt(J_var) + eps)
    return (-1.0 * cc + 1.0) * 512.0 * 512.0 / num


if __name__ == "__main__":
    key = jax.random.PRNGKey(0)
    k1, k2, k3, k4 = jax.random.split(key, 4)
    loss_fn = SimLoss(gamma=2.0)

    # Small single-channel registration images; intensities in [0, 2) so ~25%
    # of pixels pass both >=1 masks (num > 0).
    for shape in ((1, 1, 64, 64), (1, 1, 60, 50)):   # aligned + ragged/pad path
        reference = jax.random.uniform(k1, shape, jnp.float32, 0.0, 2.0)
        sensed_tran = jax.random.uniform(k2, shape, jnp.float32, 0.0, 2.0)
        sensed = jax.random.uniform(k3, shape, jnp.float32, 0.0, 2.0)
        reference_inv_tran = jax.random.uniform(k4, shape, jnp.float32, 0.0, 2.0)

        for descriptor, similarity in (("CFOG", "SSD"), ("LSS", "NCC")):
            out = jax.block_until_ready(
                loss_fn(reference, sensed_tran, sensed, reference_inv_tran,
                        descriptor, similarity))
            ref = 0.5 * (_ref_pair_loss(reference, sensed_tran, similarity) +
                         _ref_pair_loss(sensed, reference_inv_tran, similarity))
            assert jnp.allclose(out, ref, rtol=1e-3, atol=1e-3), (
                shape, similarity, out, ref)

    print("KERNEL_OK")
</pallas_src>

<mosaic_0001>
module attributes {stable_mosaic.version = 11 : i64} {
  func.func @_sim_sums_kernel(%arg0: i32, %arg1: i32, %arg2: memref<16x128xf32, #tpu.memory_space<vmem>>, %arg3: memref<16x128xf32, #tpu.memory_space<vmem>>, %arg4: memref<16x128xf32, #tpu.memory_space<vmem>>, %arg5: memref<16x128xf32, #tpu.memory_space<vmem>>, %arg6: memref<1x4x8x128xf32, #tpu.memory_space<vmem>>) attributes {dimension_semantics = [#tpu.dimension_semantics<parallel>, #tpu.dimension_semantics<arbitrary>], iteration_bounds = array<i64: 2, 1>, scalar_prefetch = 0 : i64, scratch_operands = 0 : i64, tpu.core_type = #tpu.core_type<tc>, window_params = [{transform_indices = @transform_0, window_bounds = array<i64: 16, 128>}, {transform_indices = @transform_1, window_bounds = array<i64: 16, 128>}, {transform_indices = @transform_2, window_bounds = array<i64: 16, 128>}, {transform_indices = @transform_3, window_bounds = array<i64: 16, 128>}, {transform_indices = @transform_4, window_bounds = array<i64: 1, 4, 8, 128>}]} {
    %c0_i32 = arith.constant 0 : i32
    %0 = arith.cmpi eq, %arg1, %c0_i32 : i32
    %1 = arith.extui %0 : i1 to i32
    %c0_i32_0 = arith.constant 0 : i32
    %2 = arith.cmpi ne, %1, %c0_i32_0 : i32
    scf.if %2 {
      %cst_62 = arith.constant 0.000000e+00 : f32
      %107 = vector.broadcast %cst_62 : f32 to vector<1x4x8x128xf32>
      %c0_63 = arith.constant 0 : index
      %c0_64 = arith.constant 0 : index
      %c0_65 = arith.constant 0 : index
      %c0_66 = arith.constant 0 : index
      %108 = vector.load %arg6[%c0_63, %c0_64, %c0_65, %c0_66] : memref<1x4x8x128xf32, #tpu.memory_space<vmem>>, vector<1x4x8x128xf32>
      tpu.vector_store %arg6[%c0_63, %c0_64, %c0_65, %c0_66], %107 {strides = array<i32>} : memref<1x4x8x128xf32, #tpu.memory_space<vmem>>, vector<1x4x8x128xf32>,
    } else {
    }
    %cst = arith.constant 0.000000e+00 : f32
    %3 = vector.broadcast %cst : f32 to vector<8x128xf32>
    %cst_1 = arith.constant 0.000000e+00 : f32
    %4 = vector.broadcast %cst_1 : f32 to vector<8x128xf32>
    %cst_2 = arith.constant 0.000000e+00 : f32
    %5 = vector.broadcast %cst_2 : f32 to vector<8x128xf32>
    %cst_3 = arith.constant 0.000000e+00 : f32
    %6 = vector.broadcast %cst_3 : f32 to vector<8x128xf32>
    %c0_i32_4 = arith.constant 0 : i32
    %c8_i32 = arith.constant 8 : i32
    %7 = arith.muli %c0_i32_4, %c8_i32 : i32
    %8 = tpu.assume_multiple %7, 8 : i32
    %9 = arith.index_cast %8 : i32 to index
    %c0 = arith.constant 0 : index
    %10 = vector.load %arg2[%9, %c0] : memref<16x128xf32, #tpu.memory_space<vmem>>, vector<8x128xf32>
    %11 = arith.index_cast %8 : i32 to index
    %c0_5 = arith.constant 0 : index
    %12 = vector.load %arg3[%11, %c0_5] : memref<16x128xf32, #tpu.memory_space<vmem>>, vector<8x128xf32>
    %13 = arith.index_cast %8 : i32 to index
    %c0_6 = arith.constant 0 : index
    %14 = vector.load %arg4[%13, %c0_6] : memref<16x128xf32, #tpu.memory_space<vmem>>, vector<8x128xf32>
    %15 = arith.index_cast %8 : i32 to index
    %c0_7 = arith.constant 0 : index
    %16 = vector.load %arg5[%15, %c0_7] : memref<16x128xf32, #tpu.memory_space<vmem>>, vector<8x128xf32>
    %cst_8 = arith.constant 1.000000e+00 : f32
    %17 = vector.broadcast %cst_8 : f32 to vector<8x128xf32>
    %18 = arith.cmpf oge, %10, %17 : vector<8x128xf32>
    %cst_9 = arith.constant 1.000000e+00 : f32
    %19 = vector.broadcast %cst_9 : f32 to vector<8x128xf32>
    %20 = arith.cmpf oge, %12, %19 : vector<8x128xf32>
    %21 = arith.andi %18, %20 : vector<8x128xi1>
    %cst_10 = arith.constant 1.000000e+00 : f32
    %cst_11 = arith.constant 0.000000e+00 : f32
    %22 = vector.broadcast %cst_10 : f32 to vector<8x128xf32>
    %23 = vector.broadcast %cst_11 : f32 to vector<8x128xf32>
    %24 = arith.select %21, %22, %23 : vector<8x128xi1>, vector<8x128xf32>
    %25 = arith.subf %10, %12 : vector<8x128xf32>
    %cst_12 = arith.constant 0.000000e+00 : f32
    %26 = vector.broadcast %cst_12 : f32 to vector<8x128xf32>
    %27 = arith.select %21, %25, %26 : vector<8x128xi1>, vector<8x128xf32>
    %28 = arith.mulf %27, %27 : vector<8x128xf32>
    %cst_13 = arith.constant 1.000000e+00 : f32
    %29 = vector.broadcast %cst_13 : f32 to vector<8x128xf32>
    %30 = arith.cmpf oge, %14, %29 : vector<8x128xf32>
    %cst_14 = arith.constant 1.000000e+00 : f32
    %31 = vector.broadcast %cst_14 : f32 to vector<8x128xf32>
    %32 = arith.cmpf oge, %16, %31 : vector<8x128xf32>
    %33 = arith.andi %30, %32 : vector<8x128xi1>
    %cst_15 = arith.constant 1.000000e+00 : f32
    %cst_16 = arith.constant 0.000000e+00 : f32
    %34 = vector.broadcast %cst_15 : f32 to vector<8x128xf32>
    %35 = vector.broadcast %cst_16 : f32 to vector<8x128xf32>
    %36 = arith.select %33, %34, %35 : vector<8x128xi1>, vector<8x128xf32>
    %37 = arith.subf %14, %16 : vector<8x128xf32>
    %cst_17 = arith.constant 0.000000e+00 : f32
    %38 = vector.broadcast %cst_17 : f32 to vector<8x128xf32>
    %39 = arith.select %33, %37, %38 : vector<8x128xi1>, vector<8x128xf32>
    %40 = arith.mulf %39, %39 : vector<8x128xf32>
    %41 = arith.addf %3, %24 : vector<8x128xf32>
    %42 = arith.addf %4, %28 : vector<8x128xf32>
    %43 = arith.addf %5, %36 : vector<8x128xf32>
    %44 = arith.addf %6, %40 : vector<8x128xf32>
    %c1_i32 = arith.constant 1 : i32
    %c8_i32_18 = arith.constant 8 : i32
    %45 = arith.muli %c1_i32, %c8_i32_18 : i32
    %46 = tpu.assume_multiple %45, 8 : i32
    %47 = arith.index_cast %46 : i32 to index
    %c0_19 = arith.constant 0 : index
    %48 = vector.load %arg2[%47, %c0_19] : memref<16x128xf32, #tpu.memory_space<vmem>>, vector<8x128xf32>
    %49 = arith.index_cast %46 : i32 to index
    %c0_20 = arith.constant 0 : index
    %50 = vector.load %arg3[%49, %c0_20] : memref<16x128xf32, #tpu.memory_space<vmem>>, vector<8x128xf32>
    %51 = arith.index_cast %46 : i32 to index
    %c0_21 = arith.constant 0 : index
    %52 = vector.load %arg4[%51, %c0_21] : memref<16x128xf32, #tpu.memory_space<vmem>>, vector<8x128xf32>
    %53 = arith.index_cast %46 : i32 to index
    %c0_22 = arith.constant 0 : index
    %54 = vector.load %arg5[%53, %c0_22] : memref<16x128xf32, #tpu.memory_space<vmem>>, vector<8x128xf32>
    %cst_23 = arith.constant 1.000000e+00 : f32
    %55 = vector.broadcast %cst_23 : f32 to vector<8x128xf32>
    %56 = arith.cmpf oge, %48, %55 : vector<8x128xf32>
    %cst_24 = arith.constant 1.000000e+00 : f32
    %57 = vector.broadcast %cst_24 : f32 to vector<8x128xf32>
    %58 = arith.cmpf oge, %50, %57 : vector<8x128xf32>
    %59 = arith.andi %56, %58 : vector<8x128xi1>
    %cst_25 = arith.constant 1.000000e+00 : f32
    %cst_26 = arith.constant 0.000000e+00 : f32
    %60 = vector.broadcast %cst_25 : f32 to vector<8x128xf32>
    %61 = vector.broadcast %cst_26 : f32 to vector<8x128xf32>
    %62 = arith.select %59, %60, %61 : vector<8x128xi1>, vector<8x128xf32>
    %63 = arith.subf %48, %50 : vector<8x128xf32>
    %cst_27 = arith.constant 0.000000e+00 : f32
    %64 = vector.broadcast %cst_27 : f32 to vector<8x128xf32>
    %65 = arith.select %59, %63, %64 : vector<8x128xi1>, vector<8x128xf32>
    %66 = arith.mulf %65, %65 : vector<8x128xf32>
    %cst_28 = arith.constant 1.000000e+00 : f32
    %67 = vector.broadcast %cst_28 : f32 to vector<8x128xf32>
    %68 = arith.cmpf oge, %52, %67 : vector<8x128xf32>
    %cst_29 = arith.constant 1.000000e+00 : f32
    %69 = vector.broadcast %cst_29 : f32 to vector<8x128xf32>
    %70 = arith.cmpf oge, %54, %69 : vector<8x128xf32>
    %71 = arith.andi %68, %70 : vector<8x128xi1>
    %cst_30 = arith.constant 1.000000e+00 : f32
    %cst_31 = arith.constant 0.000000e+00 : f32
    %72 = vector.broadcast %cst_30 : f32 to vector<8x128xf32>
    %73 = vector.broadcast %cst_31 : f32 to vector<8x128xf32>
    %74 = arith.select %71, %72, %73 : vector<8x128xi1>, vector<8x128xf32>
    %75 = arith.subf %52, %54 : vector<8x128xf32>
    %cst_32 = arith.constant 0.000000e+00 : f32
    %76 = vector.broadcast %cst_32 : f32 to vector<8x128xf32>
    %77 = arith.select %71, %75, %76 : vector<8x128xi1>, vector<8x128xf32>
    %78 = arith.mulf %77, %77 : vector<8x128xf32>
    %79 = arith.addf %41, %62 : vector<8x128xf32>
    %80 = arith.addf %42, %66 : vector<8x128xf32>
    %81 = arith.addf %43, %74 : vector<8x128xf32>
    %82 = arith.addf %44, %78 : vector<8x128xf32>
    %c2_i32 = arith.constant 2 : i32
    %c0_33 = arith.constant 0 : index
    %c0_34 = arith.constant 0 : index
    %c0_35 = arith.constant 0 : index
    %c0_36 = arith.constant 0 : index
    %83 = vector.load %arg6[%c0_33, %c0_34, %c0_35, %c0_36] : memref<1x4x8x128xf32, #tpu.memory_space<vmem>>, vector<1x1x8x128xf32>
    %84 = vector.shape_cast %83 : vector<1x1x8x128xf32> to vector<8x128xf32>
    %85 = arith.addf %84, %79 : vector<8x128xf32>
    %c0_37 = arith.constant 0 : index
    %c0_38 = arith.constant 0 : index
    %c0_39 = arith.constant 0 : index
    %c0_40 = arith.constant 0 : index
    %86 = vector.load %arg6[%c0_37, %c0_38, %c0_39, %c0_40] : memref<1x4x8x128xf32, #tpu.memory_space<vmem>>, vector<1x1x8x128xf32>
    %87 = vector.shape_cast %86 : vector<1x1x8x128xf32> to vector<8x128xf32>
    %88 = vector.shape_cast %85 : vector<8x128xf32> to vector<1x1x8x128xf32>
    tpu.vector_store %arg6[%c0_37, %c0_38, %c0_39, %c0_40], %88 {strides = array<i32>} : memref<1x4x8x128xf32, #tpu.memory_space<vmem>>, vector<1x1x8x128xf32>,
    %c0_41 = arith.constant 0 : index
    %c1 = arith.constant 1 : index
    %c0_42 = arith.constant 0 : index
    %c0_43 = arith.constant 0 : index
    %89 = vector.load %arg6[%c0_41, %c1, %c0_42, %c0_43] : memref<1x4x8x128xf32, #tpu.memory_space<vmem>>, vector<1x1x8x128xf32>
    %90 = vector.shape_cast %89 : vector<1x1x8x128xf32> to vector<8x128xf32>
    %91 = arith.addf %90, %80 : vector<8x128xf32>
    %c0_44 = arith.constant 0 : index
    %c1_45 = arith.constant 1 : index
    %c0_46 = arith.constant 0 : index
    %c0_47 = arith.constant 0 : index
    %92 = vector.load %arg6[%c0_44, %c1_45, %c0_46, %c0_47] : memref<1x4x8x128xf32, #tpu.memory_space<vmem>>, vector<1x1x8x128xf32>
    %93 = vector.shape_cast %92 : vector<1x1x8x128xf32> to vector<8x128xf32>
    %94 = vector.shape_cast %91 : vector<8x128xf32> to vector<1x1x8x128xf32>
    tpu.vector_store %arg6[%c0_44, %c1_45, %c0_46, %c0_47], %94 {strides = array<i32>} : memref<1x4x8x128xf32, #tpu.memory_space<vmem>>, vector<1x1x8x128xf32>,
    %c0_48 = arith.constant 0 : index
    %c2 = arith.constant 2 : index
    %c0_49 = arith.constant 0 : index
    %c0_50 = arith.constant 0 : index
    %95 = vector.load %arg6[%c0_48, %c2, %c0_49, %c0_50] : memref<1x4x8x128xf32, #tpu.memory_space<vmem>>, vector<1x1x8x128xf32>
    %96 = vector.shape_cast %95 : vector<1x1x8x128xf32> to vector<8x128xf32>
    %97 = arith.addf %96, %81 : vector<8x128xf32>
    %c0_51 = arith.constant 0 : index
    %c2_52 = arith.constant 2 : index
    %c0_53 = arith.constant 0 : index
    %c0_54 = arith.constant 0 : index
    %98 = vector.load %arg6[%c0_51, %c2_52, %c0_53, %c0_54] : memref<1x4x8x128xf32, #tpu.memory_space<vmem>>, vector<1x1x8x128xf32>
    %99 = vector.shape_cast %98 : vector<1x1x8x128xf32> to vector<8x128xf32>
    %100 = vector.shape_cast %97 : vector<8x128xf32> to vector<1x1x8x128xf32>
    tpu.vector_store %arg6[%c0_51, %c2_52, %c0_53, %c0_54], %100 {strides = array<i32>} : memref<1x4x8x128xf32, #tpu.memory_space<vmem>>, vector<1x1x8x128xf32>,
    %c0_55 = arith.constant 0 : index
    %c3 = arith.constant 3 : index
    %c0_56 = arith.constant 0 : index
    %c0_57 = arith.constant 0 : index
    %101 = vector.load %arg6[%c0_55, %c3, %c0_56, %c0_57] : memref<1x4x8x128xf32, #tpu.memory_space<vmem>>, vector<1x1x8x128xf32>
    %102 = vector.shape_cast %101 : vector<1x1x8x128xf32> to vector<8x128xf32>
    %103 = arith.addf %102, %82 : vector<8x128xf32>
    %c0_58 = arith.constant 0 : index
    %c3_59 = arith.constant 3 : index
    %c0_60 = arith.constant 0 : index
    %c0_61 = arith.constant 0 : index
    %104 = vector.load %arg6[%c0_58, %c3_59, %c0_60, %c0_61] : memref<1x4x8x128xf32, #tpu.memory_space<vmem>>, vector<1x1x8x128xf32>
    %105 = vector.shape_cast %104 : vector<1x1x8x128xf32> to vector<8x128xf32>
    %106 = vector.shape_cast %103 : vector<8x128xf32> to vector<1x1x8x128xf32>
    tpu.vector_store %arg6[%c0_58, %c3_59, %c0_60, %c0_61], %106 {strides = array<i32>} : memref<1x4x8x128xf32, #tpu.memory_space<vmem>>, vector<1x1x8x128xf32>,
    return
  }
  func.func @transform_0(%arg0: i32, %arg1: i32) -> (i32, i32) {
    %c1_i32 = arith.constant 1 : i32
    %0 = arith.muli %arg0, %c1_i32 : i32
    %1 = arith.addi %0, %arg1 : i32
    %c1_i32_0 = arith.constant 1 : i32
    %2 = arith.minsi %1, %c1_i32_0 : i32
    %c0_i32 = arith.constant 0 : i32
    %c0_i32_1 = arith.constant 0 : i32
    return %2, %c0_i32 : i32, i32
  }
  func.func @transform_1(%arg0: i32, %arg1: i32) -> (i32, i32) {
    %c1_i32 = arith.constant 1 : i32
    %0 = arith.muli %arg0, %c1_i32 : i32
    %1 = arith.addi %0, %arg1 : i32
    %c1_i32_0 = arith.constant 1 : i32
    %2 = arith.minsi %1, %c1_i32_0 : i32
    %c0_i32 = arith.constant 0 : i32
    %c0_i32_1 = arith.constant 0 : i32
    return %2, %c0_i32 : i32, i32
  }
  func.func @transform_2(%arg0: i32, %arg1: i32) -> (i32, i32) {
    %c1_i32 = arith.constant 1 : i32
    %0 = arith.muli %arg0, %c1_i32 : i32
    %1 = arith.addi %0, %arg1 : i32
    %c1_i32_0 = arith.constant 1 : i32
    %2 = arith.minsi %1, %c1_i32_0 : i32
    %c0_i32 = arith.constant 0 : i32
    %c0_i32_1 = arith.constant 0 : i32
    return %2, %c0_i32 : i32, i32
  }
  func.func @transform_3(%arg0: i32, %arg1: i32) -> (i32, i32) {
    %c1_i32 = arith.constant 1 : i32
    %0 = arith.muli %arg0, %c1_i32 : i32
    %1 = arith.addi %0, %arg1 : i32
    %c1_i32_0 = arith.constant 1 : i32
    %2 = arith.minsi %1, %c1_i32_0 : i32
    %c0_i32 = arith.constant 0 : i32
    %c0_i32_1 = arith.constant 0 : i32
    return %2, %c0_i32 : i32, i32
  }
  func.func @transform_4(%arg0: i32, %arg1: i32) -> (i32, i32, i32, i32) {
    %c0_i32 = arith.constant 0 : i32
    %c0_i32_0 = arith.constant 0 : i32
    %c0_i32_1 = arith.constant 0 : i32
    %c0_i32_2 = arith.constant 0 : i32
    return %arg0, %c0_i32, %c0_i32_0, %c0_i32_1 : i32, i32, i32, i32
  }
}

</mosaic_0001>

<bundles_post_ra>
// kernel: sim_loss_forward.1
= control target key start
LH: loop header
LB: loop body
LE: loop exit
PB: predicated region body
PF: predicated region fallthrough
CT: control target
= control target key end

     0   :  { %s635_s15 = smov 0   ;;  %s637_s16 = smov 0   ;;  %s681_s0 = inlined_call_operand.vmem [shape: f32[32,128], index: 0, kind: input, shape index: {}]   ;;  %s682_s1 = inlined_call_operand.vmem [shape: f32[32,128], index: 1, kind: input, shape index: {}]   ;;  %s683_s2 = inlined_call_operand.vmem [shape: f32[32,128], index: 2, kind: input, shape index: {}]   ;;  %s684_s3 = inlined_call_operand.vmem [shape: f32[32,128], index: 3, kind: input, shape index: {}]   ;;  %s685_s4 = inlined_call_operand.vmem [shape: f32[2,4,8,128], index: 4, kind: output, shape index: {}]  }
   0x1   :  { %s639_s17 = smov 0  }
   0x2 LB: > { %s26_s18 = sadd.s32 1, %s603_s16  ;;  %p536_p0 = scmp.ge.s32.totalorder %s607_s17, 1  ;;  %s607_s17 = sphi %s639_s17, %s14_s17   ;;  %s603_s16 = sphi %s637_s16, %s687_s16   ;;  %s599_s15 = sphi %s635_s15, %s686_s15  }
   0x3   : > { %p28_p1 = scmp.ge.s32.totalorder %s26_s18, 2  ;;  %p256_p2 = scmp.lt.s32.totalorder %s607_s17, 3 }
   0x5   : > { %s689_s18 = smov (%p28_p1, %s26_s18), 0  ;;  %p257_p3 = pnand %p536_p0, %p256_p2 }
   0x6   : > { %p310_p4 = scmp.lt.s32.totalorder (!%p257_p3), %s599_s15, 1 }
   0x7   : > { %260 = sbr.rel (%p257_p3) target bundleno = 33 (0x21), region = 36 }
   0xc   : > { %s691_s15 = smov (!%p310_p4, %s599_s15), 1  ;;  %v609_v10 = vmov 0.0  }
   0xd   : > { %s537_s19 = sshll.u32 %s691_s15, 1  ;;  %s559_s7 = sshll.u32 %s691_s15, 5 }
   0xe   : > { %p313_p5 = scmp.lt.s32.totalorder %s537_s19, 3  ;;  %s361_s10 = scalar_lea.vmem %s685_s4, %s559_s7 }
  0x10   : > { %s693_s19 = smov (!%p313_p5, %s537_s19), 3 }
  0x11   : > { %s538_s20 = sshll.u32 %s693_s19, 3 }
  0x12   : > { %s316_s23 = scalar_lea.vmem %s681_s0, %s538_s20  ;;  %s328_s26 = scalar_lea.vmem %s682_s1, %s538_s20 }
  0x13   : > { %v370_v0 = vld [vmem:[%s316_s23] sm:$0xff]  ;;  %v547_v2 = vld [vmem:[%s316_s23 + $0x8] sm:$0xff]  ;;  %s340_s29 = scalar_lea.vmem %s683_s2, %s538_s20  ;;  %s352_s6 = scalar_lea.vmem %s684_s3, %s538_s20 }
  0x14   : > { %v371_v1 = vld [vmem:[%s328_s26] sm:$0xff]  ;;  %vm374_vm0 = vcmp.ge.f32.partialorder %v370_v0, 1.0  ;;  %v548_v3 = vld [vmem:[%s328_s26 + $0x8] sm:$0xff]  ;;  %vm400_vm2 = vcmp.ge.f32.partialorder %v547_v2, 1.0 }
  0x15   : > { %vm375_vm1 = vcmp.ge.f32.partialorder %v371_v1, 1.0  ;;  %v378_v4 = vsub.f32 %v370_v0, %v371_v1  ;;  %v372_v5 = vld [vmem:[%s340_s29] sm:$0xff]  ;;  %vm401_vm4 = vcmp.ge.f32.partialorder %v548_v3, 1.0  ;;  %v404_v7 = vsub.f32 %v547_v2, %v548_v3  ;;  %v549_v8 = vld [vmem:[%s340_s29 + $0x8] sm:$0xff] }
  0x16   : > { %v373_v6 = vld [vmem:[%s352_s6] sm:$0xff]  ;;  %vm376_vm3 = vmand %vm374_vm0, %vm375_vm1  ;;  %vm381_vm5 = vcmp.ge.f32.partialorder %v372_v5, 1.0  ;;  %v550_v9 = vld [vmem:[%s352_s6 + $0x8] sm:$0xff]  ;;  %vm407_vm8 = vcmp.ge.f32.partialorder %v549_v8, 1.0 }
  0x17   : > { %vm382_vm6 = vcmp.ge.f32.partialorder %v373_v6, 1.0  ;;  %v377_v11 = vsel %vm376_vm3, 1.0, %v609_v10  ;;  %vm402_vm7 = vmand %vm400_vm2, %vm401_vm4  ;;  %v379_v12 = vsel %vm376_vm3, %v378_v4, 0.0  ;;  %vm408_vm9 = vcmp.ge.f32.partialorder %v550_v9, 1.0 }
  0x18   : > { %v403_v13 = vsel %vm402_vm7, 1.0, %v609_v10  ;;  %v380_v14 = vmul.f32 %v379_v12, %v379_v12  ;;  %v405_v15 = vsel %vm402_vm7, %v404_v7, 0.0  ;;  %vm383_vm10 = vmand %vm381_vm5, %vm382_vm6  ;;  %v385_v16 = vsub.f32 %v372_v5, %v373_v6 }
  0x19   : > { %v414_v17 = vadd.f32 %v403_v13, %v377_v11  ;;  %v406_v18 = vmul.f32 %v405_v15, %v405_v15  ;;  %v384_v19 = vsel %vm383_vm10, 1.0, %v609_v10  ;;  %vm409_vm11 = vmand %vm407_vm8, %vm408_vm9  ;;  %v411_v20 = vsub.f32 %v549_v8, %v550_v9 }
  0x1a   : > { %v410_v21 = vsel %vm409_vm11, 1.0, %v609_v10  ;;  %v386_v22 = vsel %vm383_vm10, %v385_v16, 0.0 }
  0x1b   : > { %v415_v23 = vadd.f32 %v406_v18, %v380_v14  ;;  %v416_v24 = vadd.f32 %v410_v21, %v384_v19  ;;  %v387_v25 = vmul.f32 %v386_v22, %v386_v22  ;;  %v412_v26 = vsel %vm409_vm11, %v411_v20, 0.0  ;;  %420 = vst [vmem:[%s361_s10] sm:$0xff] %v414_v17 }
  0x1c   : > { %v413_v27 = vmul.f32 %v412_v26, %v412_v26 }
  0x1d   : > { %552 = vst [vmem:[%s361_s10 + $0x8] sm:$0xff] %v415_v23  ;;  %554 = vst [vmem:[%s361_s10 + $0x10] sm:$0xff] %v416_v24 }
  0x1e   : > { %v417_v28 = vadd.f32 %v413_v27, %v387_v25 }
  0x20   : > { %556 = vst [vmem:[%s361_s10 + $0x18] sm:$0xff] %v417_v28 }
  0x21 PF: > { %s14_s17 = sadd.s32 1, %s607_s17   ;;  %s686_s15 = smov %s603_s16 }
  0x22   : > { %p11_p6 = scmp.ge.s32.totalorder %s14_s17, 4   ;;  %s687_s16 = smov %s689_s18 }
  0x24   :  { %13 = sbr.rel (!%p11_p6) target bundleno = 2 (0x2), region = 86 }

</bundles_post_ra>
